<compile_context>
chip_gen: v6e
topology: v6e:2x2x1
jax: 0.10.0
libtpu: 0.0.40
codegen_flags: <defaults>
</compile_context>

<pallas_src>
import functools

import numpy as np
import jax
import jax.numpy as jnp
from jax.experimental import pallas as pl
from jax.experimental.pallas import tpu as pltpu

EPSFrame = 0.001
dilBound = 3.0
transMax = 3.0
transMin = float(np.log(0.075))

_LOG_EPS = float(np.log(EPSFrame))
_LOG_HALF = float(np.log(0.5))
_TAN_PI_8 = 0.4142135623730951


# ----------------------------------------------------------------------------
# in-kernel helpers
# ----------------------------------------------------------------------------
def _atan2_kernel(y, x):
    """torch.angle-compatible atan2 built from abs/min/max/select, one
    EUP approx-reciprocal (+1 Newton step) and a cephes odd minimax polynomial
    (range-reduced to |q| <= tan(pi/8))."""
    pi = jnp.float32(np.pi)
    ay = jnp.abs(y)
    ax = jnp.abs(x)
    mx = jnp.maximum(ay, ax)
    mn = jnp.minimum(ay, ax)
    # r = mn/mx in [0, 1]:
    #   r <= tan(pi/8): atan(r) = P(mn/mx)
    #   r >  tan(pi/8): atan(r) = pi/4 + P((mn-mx)/(mn+mx))
    mid = mn > jnp.float32(_TAN_PI_8) * mx
    num = jnp.where(mid, mn - mx, mn)
    den = jnp.where(mid, mn + mx, mx)
    den = jnp.where(den > 0.0, den, jnp.float32(1.0))   # y == x == 0 -> angle 0
    rcp = pl.reciprocal(den, approx=True)               # EUP (free slot)
    rcp = rcp * (2.0 - den * rcp)                       # one Newton step (VALU)
    q = num * rcp
    z = q * q
    p = (((8.05374449538e-2 * z - 1.38776856032e-1) * z
          + 1.99777106478e-1) * z - 3.33329491539e-1) * z * q + q
    t = p + jnp.where(mid, jnp.float32(np.pi / 4), jnp.float32(0.0))
    phi1 = jnp.where(ay > ax, jnp.float32(np.pi / 2) - t, t)   # first quadrant
    phi = jnp.where(x < 0.0, pi - phi1, phi1)
    return jnp.where(y < 0.0, -phi, phi)                 # angle(0,0) stays 0


# ----------------------------------------------------------------------------
# kernel: one (Rblk, S*S) block of flattened (b*C) planes per grid step
# ----------------------------------------------------------------------------
def _operators_kernel(S, params_ref, col_ref, x_ref,
                      h_ref, lnA_ref, phi_ref, lnT_ref, psi_ref):
    L = S * S
    x = x_ref[...].astype(jnp.float32)   # cast in-kernel (no extra HBM pass)
    col = col_ref[...]                   # (1, S*S) int32, phi index j = p % S

    # per-row (= per-channel) constants, lane-broadcast against (R, L)
    df_r = params_ref[:, 0:1]
    df_i = params_ref[:, 1:2]
    k_r = params_ref[:, 2:3]             # k = d2f / df^2
    k_i = params_ref[:, 3:4]
    log_df = params_ref[:, 4:5]          # log|df|

    # --- fused stencil -------------------------------------------------------
    # TODO(synk): rsOrder02 is not defined in the provided source; approximated
    # as complex periodic central differences (d/dtheta + i d/dphi) on the
    # 2B x 2B grid (theta = rows, phi = cols of each flattened plane).
    def rot(v, s):                       # flat periodic roll (jnp.roll semantics)
        return pltpu.roll(v, s % L, axis=1)

    x_tp = rot(x, -S)                                            # x[(i+1)%S, j]
    x_tm = rot(x, S)                                             # x[(i-1)%S, j]
    x_pp = jnp.where(col == S - 1, rot(x, S - 1), rot(x, -1))    # x[i, (j+1)%S]
    x_pm = jnp.where(col == 0, rot(x, -(S - 1)), rot(x, 1))      # x[i, (j-1)%S]

    dx_r = 0.5 * (x_tp - x_tm)
    dx_i = 0.5 * (x_pp - x_pm)
    d2x_r = x_tp - 2.0 * x + x_tm
    d2x_i = x_pp - 2.0 * x + x_pm

    eps2 = jnp.float32(EPSFrame * EPSFrame)

    # h = |dx0|^2 (all positions); valid = not isOrigin(dx0, eps)
    # TODO(synk): isOrigin is not defined in the provided source; assumed |z| < eps.
    h = dx_r * dx_r + dx_i * dx_i
    h_ref[...] = h
    valid = h >= eps2

    # Phi = angle(a2) = angle(df / dx0) = angle(df * conj(dx0)) (positive scale)
    a_r = df_r * dx_r + df_i * dx_i
    a_i = df_i * dx_r - df_r * dx_i
    phi_ref[...] = jnp.where(valid, _atan2_kernel(a_i, a_r), 0.0)

    # lnAlpha = hardtanh(log|a2|) = hardtanh(log|df| - 0.5*log h)
    log_h = jnp.log(jnp.where(valid, h, 1.0))
    lnA = jnp.clip(log_df - 0.5 * log_h, -dilBound, dilBound)
    lnA_ref[...] = jnp.where(valid, lnA, 0.0)

    # an = 0.5*(d2x0 - dx0^2*(d2f/df^2)) * df / dx0^2 ;  w = dx0^2, t = d2x0 - w*k
    w_r = dx_r * dx_r - dx_i * dx_i
    w_i = 2.0 * dx_r * dx_i
    t_r = d2x_r - (w_r * k_r - w_i * k_i)
    t_i = d2x_i - (w_r * k_i + w_i * k_r)
    t2 = t_r * t_r + t_i * t_i

    # log|an| = log(1/2) + 0.5*log|t|^2 + log|df| - log h ; the "translation"
    # mask is done in the log domain (no h*h overflow): |an| >= eps
    log_t2 = jnp.log(t2)                        # -inf when t2 == 0 (handled below)
    lnT_raw = jnp.float32(_LOG_HALF) + 0.5 * log_t2 + log_df - log_h
    mask_t = jnp.logical_and(valid, lnT_raw >= jnp.float32(_LOG_EPS))
    lnT = jnp.clip(lnT_raw, transMin, transMax)
    lnT_ref[...] = jnp.where(mask_t, lnT, jnp.float32(_LOG_EPS))

    # Psi = angle(an) = angle(t * df * conj(w))          (positive 0.5/h^2 scale)
    u_r = t_r * df_r - t_i * df_i
    u_i = t_r * df_i + t_i * df_r
    q_r = u_r * w_r + u_i * w_i
    q_i = u_i * w_r - u_r * w_i
    psi_ref[...] = jnp.where(mask_t, _atan2_kernel(q_i, q_r), 0.0)


# ----------------------------------------------------------------------------
# glue
# ----------------------------------------------------------------------------
def init_params(channels):
    # matches torch.nn.init.zeros_ on self.df / self.d2f, shapes (1, channels, 2)
    return (jnp.zeros((1, channels, 2), jnp.float32),
            jnp.zeros((1, channels, 2), jnp.float32))


def _per_channel_params(df_param, d2f_param):
    """Hoisted per-channel complex algebra: df = exp(df_param), k = d2f/df^2,
    log|df|  ->  (C, 5) float32 table."""
    a = df_param[0, :, 0].astype(jnp.float32)        # log|df| (Re of param)
    th = df_param[0, :, 1].astype(jnp.float32)
    ea = jnp.exp(a)
    df_r = ea * jnp.cos(th)
    df_i = ea * jnp.sin(th)
    d2f_r = d2f_param[0, :, 0].astype(jnp.float32)
    d2f_i = d2f_param[0, :, 1].astype(jnp.float32)
    df2_r = df_r * df_r - df_i * df_i
    df2_i = 2.0 * df_r * df_i
    df2_m = df2_r * df2_r + df2_i * df2_i            # = |df|^4 = exp(4a) > 0
    k_r = (d2f_r * df2_r + d2f_i * df2_i) / df2_m
    k_i = (d2f_i * df2_r - d2f_r * df2_i) / df2_m
    return jnp.stack([df_r, df_i, k_r, k_i, a], axis=-1)   # (C, 5)


def _vmem_plan():
    """Per-generation VMEM plan: (per-plane byte budget, scoped vmem limit)."""
    phys = 64 * 1024 * 1024                   # conservative default (v7x-sized)
    try:
        phys = int(pltpu.get_tpu_info().vmem_capacity_bytes)
    except Exception:
        pass
    if phys >= 128 * 1024 * 1024:             # v5e / v6e (128 MiB physical)
        return 1024 * 1024, 96 * 1024 * 1024
    return 512 * 1024, 48 * 1024 * 1024       # v7x (64 MiB physical)


def operators_forward(x, B, df_param, d2f_param):
    b, C, H, W = x.shape
    S = 2 * B
    assert H == S and W == S, "x spatial dims must equal 2*B"
    L = S * S
    rows = b * C

    # TODO(synk): when L=(2B)^2 is not a multiple of 128 the 5 output stores fall
    # back to masked vst; lane-padding is NOT applied because the flat periodic
    # rolls would wrap at the padded length and corrupt the stencil.
    x_flat = x.reshape(rows, L)                                   # native dtype
    params_rows = jnp.tile(_per_channel_params(df_param, d2f_param), (b, 1))
    col_ids = (jnp.arange(L, dtype=jnp.int32) % S).reshape(1, L)

    plane_budget, vmem_limit = _vmem_plan()
    budget_rows = max(8, plane_budget // (4 * L))
    r_blk = max(8, (min(rows, budget_rows) // 8) * 8)
    # Keep >= 2 grid steps when possible: enables in/out double-buffer overlap
    # and dual-TensorCore sharding on v7x.
    if rows >= 16 and pl.cdiv(rows, r_blk) < 2:
        r_blk = max(8, (((rows + 1) // 2) // 8) * 8)
    grid = (pl.cdiv(rows, r_blk),)

    row_spec = pl.BlockSpec((r_blk, L), lambda g: (g, 0))
    out_shape = tuple(jax.ShapeDtypeStruct((rows, L), jnp.float32) for _ in range(5))

    n = rows * L
    cost = pl.CostEstimate(flops=130 * n, transcendentals=6 * n,
                           bytes_accessed=(jnp.dtype(x.dtype).itemsize + 5 * 4) * n)

    outs = pl.pallas_call(
        functools.partial(_operators_kernel, S),
        grid=grid,
        in_specs=[pl.BlockSpec((r_blk, 5), lambda g: (g, 0)),   # per-row constants
                  pl.BlockSpec((1, L), lambda g: (0, 0)),       # phi column index
                  row_spec],                                     # x planes
        out_specs=tuple(pl.BlockSpec((r_blk, L), lambda g: (g, 0)) for _ in range(5)),
        out_shape=out_shape,
        compiler_params=pltpu.CompilerParams(
            dimension_semantics=("parallel",),
            vmem_limit_bytes=vmem_limit),
        cost_estimate=cost,
    )(params_rows, col_ids, x_flat)

    return tuple(o.reshape(b, C, S, S) for o in outs)


# ----------------------------------------------------------------------------
# pure-JAX reference (validates pltpu.roll direction + all the fused algebra)
# ----------------------------------------------------------------------------
def _reference_forward(x, B, df_param, d2f_param):
    x = x.astype(jnp.float32)
    x_tp = jnp.roll(x, -1, axis=2)
    x_tm = jnp.roll(x, 1, axis=2)
    x_pp = jnp.roll(x, -1, axis=3)
    x_pm = jnp.roll(x, 1, axis=3)
    dx0 = ((0.5 * (x_tp - x_tm)) + 1j * (0.5 * (x_pp - x_pm))).astype(jnp.complex64)
    d2x0 = ((x_tp - 2.0 * x + x_tm) + 1j * (x_pp - 2.0 * x + x_pm)).astype(jnp.complex64)

    df = jnp.exp(df_param[0, :, 0] + 1j * df_param[0, :, 1]).astype(jnp.complex64)
    d2f = (d2f_param[0, :, 0] + 1j * d2f_param[0, :, 1]).astype(jnp.complex64)
    df = df[None, :, None, None]
    d2f = d2f[None, :, None, None]

    h = jnp.real(dx0) ** 2 + jnp.imag(dx0) ** 2
    valid = h >= jnp.float32(EPSFrame * EPSFrame)
    safe_dx0 = jnp.where(valid, dx0, 1.0 + 0.0j)
    a2 = df / safe_dx0
    an = 0.5 * (d2x0 - (1.0 / (a2 * a2)) * d2f) * df / (safe_dx0 * safe_dx0)

    lnAlpha = jnp.where(valid, jnp.clip(jnp.log(jnp.abs(a2)), -dilBound, dilBound), 0.0)
    Phi = jnp.where(valid, jnp.angle(a2), 0.0)
    mask_t = jnp.logical_and(valid, jnp.abs(an) >= EPSFrame)
    lnTau = jnp.where(mask_t, jnp.clip(jnp.log(jnp.abs(an)), transMin, transMax),
                      jnp.float32(_LOG_EPS))
    Psi = jnp.where(mask_t, jnp.angle(an), 0.0)
    return (h.astype(jnp.float32), lnAlpha.astype(jnp.float32),
            Phi.astype(jnp.float32), lnTau.astype(jnp.float32),
            Psi.astype(jnp.float32))


if __name__ == "__main__":
    b, C, B = 2, 4, 8                        # x: (2, 4, 16, 16)
    key = jax.random.PRNGKey(0)
    x = jax.random.normal(key, (b, C, 2 * B, 2 * B), dtype=jnp.float32)

    df_param, d2f_param = init_params(C)     # zeros, like the torch module init
    fwd = jax.jit(operators_forward, static_argnums=(1,))
    outs = jax.block_until_ready(fwd(x, B, df_param, d2f_param))
    h, lnAlpha, Phi, lnTau, Psi = outs

    for o in outs:
        assert o.shape == (b, C, 2 * B, 2 * B)
        assert bool(jnp.all(jnp.isfinite(o)))
    assert bool(jnp.all(h >= 0.0))

    # on-device pure-JAX reference check (also pins down the roll direction)
    ref = _reference_forward(x, B, df_param, d2f_param)
    names = ("h", "lnAlpha", "Phi", "lnTau", "Psi")
    for o, r, nm in zip(outs, ref, names):
        if nm in ("Phi", "Psi"):             # compare angles modulo 2*pi
            d = jnp.abs(jnp.mod(o - r + np.pi, 2.0 * np.pi) - np.pi)
        else:
            d = jnp.abs(o - r)
        err = float(jnp.max(d))
        assert err < 1e-4, f"{nm} mismatch vs reference: max err {err}"

    print("KERNEL_OK")
</pallas_src>

<mosaic_0001>
module attributes {stable_mosaic.version = 11 : i64} {
  func.func @_operators_kernel(%arg0: i32, %arg1: memref<8x5xf32, #tpu.memory_space<vmem>>, %arg2: memref<1x256xi32, #tpu.memory_space<vmem>>, %arg3: memref<8x256xf32, #tpu.memory_space<vmem>>, %arg4: memref<8x256xf32, #tpu.memory_space<vmem>>, %arg5: memref<8x256xf32, #tpu.memory_space<vmem>>, %arg6: memref<8x256xf32, #tpu.memory_space<vmem>>, %arg7: memref<8x256xf32, #tpu.memory_space<vmem>>, %arg8: memref<8x256xf32, #tpu.memory_space<vmem>>) attributes {dimension_semantics = [#tpu.dimension_semantics<parallel>], iteration_bounds = array<i64: 1>, scalar_prefetch = 0 : i64, scratch_operands = 0 : i64, tpu.core_type = #tpu.core_type<tc>, window_params = [{transform_indices = @transform_0, window_bounds = array<i64: 8, 5>}, {pipeline_mode = #tpu.pipeline_mode<synchronous>, transform_indices = @transform_1, window_bounds = array<i64: 1, 256>}, {transform_indices = @transform_2, window_bounds = array<i64: 8, 256>}, {transform_indices = @transform_3, window_bounds = array<i64: 8, 256>}, {transform_indices = @transform_4, window_bounds = array<i64: 8, 256>}, {transform_indices = @transform_5, window_bounds = array<i64: 8, 256>}, {transform_indices = @transform_6, window_bounds = array<i64: 8, 256>}, {transform_indices = @transform_7, window_bounds = array<i64: 8, 256>}]} {
    %c0 = arith.constant 0 : index
    %c0_0 = arith.constant 0 : index
    %0 = vector.load %arg3[%c0, %c0_0] : memref<8x256xf32, #tpu.memory_space<vmem>>, vector<8x256xf32>
    %c0_1 = arith.constant 0 : index
    %c0_2 = arith.constant 0 : index
    %1 = vector.load %arg2[%c0_1, %c0_2] : memref<1x256xi32, #tpu.memory_space<vmem>>, vector<1x256xi32>
    %c0_3 = arith.constant 0 : index
    %c0_4 = arith.constant 0 : index
    %2 = vector.load %arg1[%c0_3, %c0_4] : memref<8x5xf32, #tpu.memory_space<vmem>>, vector<8x1xf32>
    %c0_5 = arith.constant 0 : index
    %c1 = arith.constant 1 : index
    %3 = vector.load %arg1[%c0_5, %c1] : memref<8x5xf32, #tpu.memory_space<vmem>>, vector<8x1xf32>
    %c0_6 = arith.constant 0 : index
    %c2 = arith.constant 2 : index
    %4 = vector.load %arg1[%c0_6, %c2] : memref<8x5xf32, #tpu.memory_space<vmem>>, vector<8x1xf32>
    %c0_7 = arith.constant 0 : index
    %c3 = arith.constant 3 : index
    %5 = vector.load %arg1[%c0_7, %c3] : memref<8x5xf32, #tpu.memory_space<vmem>>, vector<8x1xf32>
    %c0_8 = arith.constant 0 : index
    %c4 = arith.constant 4 : index
    %6 = vector.load %arg1[%c0_8, %c4] : memref<8x5xf32, #tpu.memory_space<vmem>>, vector<8x1xf32>
    %c240_i32 = arith.constant 240 : i32
    %7 = tpu.dynamic_rotate %0 by %c240_i32 dim 1 : vector<8x256xf32>, i32 -> vector<8x256xf32>
    %c16_i32 = arith.constant 16 : i32
    %8 = tpu.dynamic_rotate %0 by %c16_i32 dim 1 : vector<8x256xf32>, i32 -> vector<8x256xf32>
    %c15_i32 = arith.constant 15 : i32
    %9 = vector.broadcast %c15_i32 : i32 to vector<1x256xi32>
    %10 = arith.cmpi eq, %1, %9 : vector<1x256xi32>
    %c15_i32_9 = arith.constant 15 : i32
    %11 = tpu.dynamic_rotate %0 by %c15_i32_9 dim 1 : vector<8x256xf32>, i32 -> vector<8x256xf32>
    %c255_i32 = arith.constant 255 : i32
    %12 = tpu.dynamic_rotate %0 by %c255_i32 dim 1 : vector<8x256xf32>, i32 -> vector<8x256xf32>
    %13 = vector.shape_cast %10 : vector<1x256xi1> to vector<1x256xi1>
    %14 = vector.broadcast %13 : vector<1x256xi1> to vector<8x256xi1>
    %15 = arith.select %14, %11, %12 : vector<8x256xi1>, vector<8x256xf32>
    %c0_i32 = arith.constant 0 : i32
    %16 = vector.broadcast %c0_i32 : i32 to vector<1x256xi32>
    %17 = arith.cmpi eq, %1, %16 : vector<1x256xi32>
    %c241_i32 = arith.constant 241 : i32
    %18 = tpu.dynamic_rotate %0 by %c241_i32 dim 1 : vector<8x256xf32>, i32 -> vector<8x256xf32>
    %c1_i32 = arith.constant 1 : i32
    %19 = tpu.dynamic_rotate %0 by %c1_i32 dim 1 : vector<8x256xf32>, i32 -> vector<8x256xf32>
    %20 = vector.shape_cast %17 : vector<1x256xi1> to vector<1x256xi1>
    %21 = vector.broadcast %20 : vector<1x256xi1> to vector<8x256xi1>
    %22 = arith.select %21, %18, %19 : vector<8x256xi1>, vector<8x256xf32>
    %23 = arith.subf %7, %8 : vector<8x256xf32>
    %cst = arith.constant 5.000000e-01 : f32
    %24 = vector.broadcast %cst : f32 to vector<8x256xf32>
    %25 = arith.mulf %24, %23 : vector<8x256xf32>
    %26 = arith.subf %15, %22 : vector<8x256xf32>
    %cst_10 = arith.constant 5.000000e-01 : f32
    %27 = vector.broadcast %cst_10 : f32 to vector<8x256xf32>
    %28 = arith.mulf %27, %26 : vector<8x256xf32>
    %cst_11 = arith.constant 2.000000e+00 : f32
    %29 = vector.broadcast %cst_11 : f32 to vector<8x256xf32>
    %30 = arith.mulf %29, %0 : vector<8x256xf32>
    %31 = arith.subf %7, %30 : vector<8x256xf32>
    %32 = arith.addf %31, %8 : vector<8x256xf32>
    %cst_12 = arith.constant 2.000000e+00 : f32
    %33 = vector.broadcast %cst_12 : f32 to vector<8x256xf32>
    %34 = arith.mulf %33, %0 : vector<8x256xf32>
    %35 = arith.subf %15, %34 : vector<8x256xf32>
    %36 = arith.addf %35, %22 : vector<8x256xf32>
    %37 = arith.mulf %25, %25 : vector<8x256xf32>
    %38 = arith.mulf %28, %28 : vector<8x256xf32>
    %39 = arith.addf %37, %38 : vector<8x256xf32>
    %c0_13 = arith.constant 0 : index
    %c0_14 = arith.constant 0 : index
    %40 = vector.load %arg4[%c0_13, %c0_14] : memref<8x256xf32, #tpu.memory_space<vmem>>, vector<8x256xf32>
    tpu.vector_store %arg4[%c0_13, %c0_14], %39 {strides = array<i32>} : memref<8x256xf32, #tpu.memory_space<vmem>>, vector<8x256xf32>,
    %cst_15 = arith.constant 9.99999997E-7 : f32
    %41 = vector.broadcast %cst_15 : f32 to vector<8x256xf32>
    %42 = arith.cmpf oge, %39, %41 : vector<8x256xf32>
    %43 = vector.broadcast %2 : vector<8x1xf32> to vector<8x256xf32>
    %44 = arith.mulf %43, %25 : vector<8x256xf32>
    %45 = vector.broadcast %3 : vector<8x1xf32> to vector<8x256xf32>
    %46 = arith.mulf %45, %28 : vector<8x256xf32>
    %47 = arith.addf %44, %46 : vector<8x256xf32>
    %48 = vector.broadcast %3 : vector<8x1xf32> to vector<8x256xf32>
    %49 = arith.mulf %48, %25 : vector<8x256xf32>
    %50 = vector.broadcast %2 : vector<8x1xf32> to vector<8x256xf32>
    %51 = arith.mulf %50, %28 : vector<8x256xf32>
    %52 = arith.subf %49, %51 : vector<8x256xf32>
    %53 = math.absf %52 : vector<8x256xf32>
    %54 = math.absf %47 : vector<8x256xf32>
    %55 = arith.maximumf %53, %54 : vector<8x256xf32>
    %56 = arith.minimumf %53, %54 : vector<8x256xf32>
    %cst_16 = arith.constant 0.414213568 : f32
    %57 = vector.broadcast %cst_16 : f32 to vector<8x256xf32>
    %58 = arith.mulf %57, %55 : vector<8x256xf32>
    %59 = arith.cmpf ogt, %56, %58 : vector<8x256xf32>
    %60 = arith.subf %56, %55 : vector<8x256xf32>
    %61 = arith.select %59, %60, %56 : vector<8x256xi1>, vector<8x256xf32>
    %62 = arith.addf %56, %55 : vector<8x256xf32>
    %63 = arith.select %59, %62, %55 : vector<8x256xi1>, vector<8x256xf32>
    %cst_17 = arith.constant 0.000000e+00 : f32
    %64 = vector.broadcast %cst_17 : f32 to vector<8x256xf32>
    %65 = arith.cmpf ogt, %63, %64 : vector<8x256xf32>
    %cst_18 = arith.constant 1.000000e+00 : f32
    %66 = vector.broadcast %cst_18 : f32 to vector<8x256xf32>
    %67 = arith.select %65, %63, %66 : vector<8x256xi1>, vector<8x256xf32>
    %68 = tpu.reciprocal %67 {approx = true} : vector<8x256xf32> -> vector<8x256xf32>
    %69 = arith.mulf %67, %68 : vector<8x256xf32>
    %cst_19 = arith.constant 2.000000e+00 : f32
    %70 = vector.broadcast %cst_19 : f32 to vector<8x256xf32>
    %71 = arith.subf %70, %69 : vector<8x256xf32>
    %72 = arith.mulf %68, %71 : vector<8x256xf32>
    %73 = arith.mulf %61, %72 : vector<8x256xf32>
    %74 = arith.mulf %73, %73 : vector<8x256xf32>
    %cst_20 = arith.constant 0.0805374458 : f32
    %75 = vector.broadcast %cst_20 : f32 to vector<8x256xf32>
    %76 = arith.mulf %75, %74 : vector<8x256xf32>
    %cst_21 = arith.constant 0.138776854 : f32
    %77 = vector.broadcast %cst_21 : f32 to vector<8x256xf32>
    %78 = arith.subf %76, %77 : vector<8x256xf32>
    %79 = arith.mulf %78, %74 : vector<8x256xf32>
    %cst_22 = arith.constant 0.199777111 : f32
    %80 = vector.broadcast %cst_22 : f32 to vector<8x256xf32>
    %81 = arith.addf %79, %80 : vector<8x256xf32>
    %82 = arith.mulf %81, %74 : vector<8x256xf32>
    %cst_23 = arith.constant 0.333329499 : f32
    %83 = vector.broadcast %cst_23 : f32 to vector<8x256xf32>
    %84 = arith.subf %82, %83 : vector<8x256xf32>
    %85 = arith.mulf %84, %74 : vector<8x256xf32>
    %86 = arith.mulf %85, %73 : vector<8x256xf32>
    %87 = arith.addf %86, %73 : vector<8x256xf32>
    %cst_24 = arith.constant 0.785398185 : f32
    %cst_25 = arith.constant 0.000000e+00 : f32
    %88 = vector.broadcast %cst_24 : f32 to vector<8x256xf32>
    %89 = vector.broadcast %cst_25 : f32 to vector<8x256xf32>
    %90 = arith.select %59, %88, %89 : vector<8x256xi1>, vector<8x256xf32>
    %91 = arith.addf %87, %90 : vector<8x256xf32>
    %92 = arith.cmpf ogt, %53, %54 : vector<8x256xf32>
    %cst_26 = arith.constant 1.57079637 : f32
    %93 = vector.broadcast %cst_26 : f32 to vector<8x256xf32>
    %94 = arith.subf %93, %91 : vector<8x256xf32>
    %95 = arith.select %92, %94, %91 : vector<8x256xi1>, vector<8x256xf32>
    %cst_27 = arith.constant 0.000000e+00 : f32
    %96 = vector.broadcast %cst_27 : f32 to vector<8x256xf32>
    %97 = arith.cmpf olt, %47, %96 : vector<8x256xf32>
    %cst_28 = arith.constant 3.14159274 : f32
    %98 = vector.broadcast %cst_28 : f32 to vector<8x256xf32>
    %99 = arith.subf %98, %95 : vector<8x256xf32>
    %100 = arith.select %97, %99, %95 : vector<8x256xi1>, vector<8x256xf32>
    %cst_29 = arith.constant 0.000000e+00 : f32
    %101 = vector.broadcast %cst_29 : f32 to vector<8x256xf32>
    %102 = arith.cmpf olt, %52, %101 : vector<8x256xf32>
    %cst_30 = arith.constant 0.000000e+00 : f32
    %103 = vector.broadcast %cst_30 : f32 to vector<8x256xf32>
    %104 = arith.subf %103, %100 : vector<8x256xf32>
    %105 = arith.select %102, %104, %100 : vector<8x256xi1>, vector<8x256xf32>
    %cst_31 = arith.constant 0.000000e+00 : f32
    %106 = vector.broadcast %cst_31 : f32 to vector<8x256xf32>
    %107 = arith.select %42, %105, %106 : vector<8x256xi1>, vector<8x256xf32>
    %c0_32 = arith.constant 0 : index
    %c0_33 = arith.constant 0 : index
    %108 = vector.load %arg6[%c0_32, %c0_33] : memref<8x256xf32, #tpu.memory_space<vmem>>, vector<8x256xf32>
    tpu.vector_store %arg6[%c0_32, %c0_33], %107 {strides = array<i32>} : memref<8x256xf32, #tpu.memory_space<vmem>>, vector<8x256xf32>,
    %cst_34 = arith.constant 1.000000e+00 : f32
    %109 = vector.broadcast %cst_34 : f32 to vector<8x256xf32>
    %110 = arith.select %42, %39, %109 : vector<8x256xi1>, vector<8x256xf32>
    %111 = math.log %110 : vector<8x256xf32>
    %cst_35 = arith.constant 5.000000e-01 : f32
    %112 = vector.broadcast %cst_35 : f32 to vector<8x256xf32>
    %113 = arith.mulf %112, %111 : vector<8x256xf32>
    %114 = vector.broadcast %6 : vector<8x1xf32> to vector<8x256xf32>
    %115 = arith.subf %114, %113 : vector<8x256xf32>
    %cst_36 = arith.constant -3.000000e+00 : f32
    %cst_37 = arith.constant 3.000000e+00 : f32
    %116 = vector.broadcast %cst_36 : f32 to vector<8x256xf32>
    %117 = arith.maximumf %116, %115 : vector<8x256xf32>
    %118 = vector.broadcast %cst_37 : f32 to vector<8x256xf32>
    %119 = arith.minimumf %118, %117 : vector<8x256xf32>
    %cst_38 = arith.constant 0.000000e+00 : f32
    %120 = vector.broadcast %cst_38 : f32 to vector<8x256xf32>
    %121 = arith.select %42, %119, %120 : vector<8x256xi1>, vector<8x256xf32>
    %c0_39 = arith.constant 0 : index
    %c0_40 = arith.constant 0 : index
    %122 = vector.load %arg5[%c0_39, %c0_40] : memref<8x256xf32, #tpu.memory_space<vmem>>, vector<8x256xf32>
    tpu.vector_store %arg5[%c0_39, %c0_40], %121 {strides = array<i32>} : memref<8x256xf32, #tpu.memory_space<vmem>>, vector<8x256xf32>,
    %123 = arith.mulf %25, %25 : vector<8x256xf32>
    %124 = arith.mulf %28, %28 : vector<8x256xf32>
    %125 = arith.subf %123, %124 : vector<8x256xf32>
    %cst_41 = arith.constant 2.000000e+00 : f32
    %126 = vector.broadcast %cst_41 : f32 to vector<8x256xf32>
    %127 = arith.mulf %126, %25 : vector<8x256xf32>
    %128 = arith.mulf %127, %28 : vector<8x256xf32>
    %129 = vector.broadcast %4 : vector<8x1xf32> to vector<8x256xf32>
    %130 = arith.mulf %125, %129 : vector<8x256xf32>
    %131 = vector.broadcast %5 : vector<8x1xf32> to vector<8x256xf32>
    %132 = arith.mulf %128, %131 : vector<8x256xf32>
    %133 = arith.subf %130, %132 : vector<8x256xf32>
    %134 = arith.subf %32, %133 : vector<8x256xf32>
    %135 = vector.broadcast %5 : vector<8x1xf32> to vector<8x256xf32>
    %136 = arith.mulf %125, %135 : vector<8x256xf32>
    %137 = vector.broadcast %4 : vector<8x1xf32> to vector<8x256xf32>
    %138 = arith.mulf %128, %137 : vector<8x256xf32>
    %139 = arith.addf %136, %138 : vector<8x256xf32>
    %140 = arith.subf %36, %139 : vector<8x256xf32>
    %141 = arith.mulf %134, %134 : vector<8x256xf32>
    %142 = arith.mulf %140, %140 : vector<8x256xf32>
    %143 = arith.addf %141, %142 : vector<8x256xf32>
    %144 = math.log %143 : vector<8x256xf32>
    %cst_42 = arith.constant 5.000000e-01 : f32
    %145 = vector.broadcast %cst_42 : f32 to vector<8x256xf32>
    %146 = arith.mulf %145, %144 : vector<8x256xf32>
    %cst_43 = arith.constant -0.693147182 : f32
    %147 = vector.broadcast %cst_43 : f32 to vector<8x256xf32>
    %148 = arith.addf %147, %146 : vector<8x256xf32>
    %149 = vector.broadcast %6 : vector<8x1xf32> to vector<8x256xf32>
    %150 = arith.addf %148, %149 : vector<8x256xf32>
    %151 = arith.subf %150, %111 : vector<8x256xf32>
    %cst_44 = arith.constant -6.90775537 : f32
    %152 = vector.broadcast %cst_44 : f32 to vector<8x256xf32>
    %153 = arith.cmpf oge, %151, %152 : vector<8x256xf32>
    %154 = arith.andi %42, %153 : vector<8x256xi1>
    %cst_45 = arith.constant -2.59026718 : f32
    %cst_46 = arith.constant 3.000000e+00 : f32
    %155 = vector.broadcast %cst_45 : f32 to vector<8x256xf32>
    %156 = arith.maximumf %155, %151 : vector<8x256xf32>
    %157 = vector.broadcast %cst_46 : f32 to vector<8x256xf32>
    %158 = arith.minimumf %157, %156 : vector<8x256xf32>
    %cst_47 = arith.constant -6.90775537 : f32
    %159 = vector.broadcast %cst_47 : f32 to vector<8x256xf32>
    %160 = arith.select %154, %158, %159 : vector<8x256xi1>, vector<8x256xf32>
    %c0_48 = arith.constant 0 : index
    %c0_49 = arith.constant 0 : index
    %161 = vector.load %arg7[%c0_48, %c0_49] : memref<8x256xf32, #tpu.memory_space<vmem>>, vector<8x256xf32>
    tpu.vector_store %arg7[%c0_48, %c0_49], %160 {strides = array<i32>} : memref<8x256xf32, #tpu.memory_space<vmem>>, vector<8x256xf32>,
    %162 = vector.broadcast %2 : vector<8x1xf32> to vector<8x256xf32>
    %163 = arith.mulf %134, %162 : vector<8x256xf32>
    %164 = vector.broadcast %3 : vector<8x1xf32> to vector<8x256xf32>
    %165 = arith.mulf %140, %164 : vector<8x256xf32>
    %166 = arith.subf %163, %165 : vector<8x256xf32>
    %167 = vector.broadcast %3 : vector<8x1xf32> to vector<8x256xf32>
    %168 = arith.mulf %134, %167 : vector<8x256xf32>
    %169 = vector.broadcast %2 : vector<8x1xf32> to vector<8x256xf32>
    %170 = arith.mulf %140, %169 : vector<8x256xf32>
    %171 = arith.addf %168, %170 : vector<8x256xf32>
    %172 = arith.mulf %166, %125 : vector<8x256xf32>
    %173 = arith.mulf %171, %128 : vector<8x256xf32>
    %174 = arith.addf %172, %173 : vector<8x256xf32>
    %175 = arith.mulf %171, %125 : vector<8x256xf32>
    %176 = arith.mulf %166, %128 : vector<8x256xf32>
    %177 = arith.subf %175, %176 : vector<8x256xf32>
    %178 = math.absf %177 : vector<8x256xf32>
    %179 = math.absf %174 : vector<8x256xf32>
    %180 = arith.maximumf %178, %179 : vector<8x256xf32>
    %181 = arith.minimumf %178, %179 : vector<8x256xf32>
    %cst_50 = arith.constant 0.414213568 : f32
    %182 = vector.broadcast %cst_50 : f32 to vector<8x256xf32>
    %183 = arith.mulf %182, %180 : vector<8x256xf32>
    %184 = arith.cmpf ogt, %181, %183 : vector<8x256xf32>
    %185 = arith.subf %181, %180 : vector<8x256xf32>
    %186 = arith.select %184, %185, %181 : vector<8x256xi1>, vector<8x256xf32>
    %187 = arith.addf %181, %180 : vector<8x256xf32>
    %188 = arith.select %184, %187, %180 : vector<8x256xi1>, vector<8x256xf32>
    %cst_51 = arith.constant 0.000000e+00 : f32
    %189 = vector.broadcast %cst_51 : f32 to vector<8x256xf32>
    %190 = arith.cmpf ogt, %188, %189 : vector<8x256xf32>
    %cst_52 = arith.constant 1.000000e+00 : f32
    %191 = vector.broadcast %cst_52 : f32 to vector<8x256xf32>
    %192 = arith.select %190, %188, %191 : vector<8x256xi1>, vector<8x256xf32>
    %193 = tpu.reciprocal %192 {approx = true} : vector<8x256xf32> -> vector<8x256xf32>
    %194 = arith.mulf %192, %193 : vector<8x256xf32>
    %cst_53 = arith.constant 2.000000e+00 : f32
    %195 = vector.broadcast %cst_53 : f32 to vector<8x256xf32>
    %196 = arith.subf %195, %194 : vector<8x256xf32>
    %197 = arith.mulf %193, %196 : vector<8x256xf32>
    %198 = arith.mulf %186, %197 : vector<8x256xf32>
    %199 = arith.mulf %198, %198 : vector<8x256xf32>
    %cst_54 = arith.constant 0.0805374458 : f32
    %200 = vector.broadcast %cst_54 : f32 to vector<8x256xf32>
    %201 = arith.mulf %200, %199 : vector<8x256xf32>
    %cst_55 = arith.constant 0.138776854 : f32
    %202 = vector.broadcast %cst_55 : f32 to vector<8x256xf32>
    %203 = arith.subf %201, %202 : vector<8x256xf32>
    %204 = arith.mulf %203, %199 : vector<8x256xf32>
    %cst_56 = arith.constant 0.199777111 : f32
    %205 = vector.broadcast %cst_56 : f32 to vector<8x256xf32>
    %206 = arith.addf %204, %205 : vector<8x256xf32>
    %207 = arith.mulf %206, %199 : vector<8x256xf32>
    %cst_57 = arith.constant 0.333329499 : f32
    %208 = vector.broadcast %cst_57 : f32 to vector<8x256xf32>
    %209 = arith.subf %207, %208 : vector<8x256xf32>
    %210 = arith.mulf %209, %199 : vector<8x256xf32>
    %211 = arith.mulf %210, %198 : vector<8x256xf32>
    %212 = arith.addf %211, %198 : vector<8x256xf32>
    %cst_58 = arith.constant 0.785398185 : f32
    %cst_59 = arith.constant 0.000000e+00 : f32
    %213 = vector.broadcast %cst_58 : f32 to vector<8x256xf32>
    %214 = vector.broadcast %cst_59 : f32 to vector<8x256xf32>
    %215 = arith.select %184, %213, %214 : vector<8x256xi1>, vector<8x256xf32>
    %216 = arith.addf %212, %215 : vector<8x256xf32>
    %217 = arith.cmpf ogt, %178, %179 : vector<8x256xf32>
    %cst_60 = arith.constant 1.57079637 : f32
    %218 = vector.broadcast %cst_60 : f32 to vector<8x256xf32>
    %219 = arith.subf %218, %216 : vector<8x256xf32>
    %220 = arith.select %217, %219, %216 : vector<8x256xi1>, vector<8x256xf32>
    %cst_61 = arith.constant 0.000000e+00 : f32
    %221 = vector.broadcast %cst_61 : f32 to vector<8x256xf32>
    %222 = arith.cmpf olt, %174, %221 : vector<8x256xf32>
    %cst_62 = arith.constant 3.14159274 : f32
    %223 = vector.broadcast %cst_62 : f32 to vector<8x256xf32>
    %224 = arith.subf %223, %220 : vector<8x256xf32>
    %225 = arith.select %222, %224, %220 : vector<8x256xi1>, vector<8x256xf32>
    %cst_63 = arith.constant 0.000000e+00 : f32
    %226 = vector.broadcast %cst_63 : f32 to vector<8x256xf32>
    %227 = arith.cmpf olt, %177, %226 : vector<8x256xf32>
    %cst_64 = arith.constant 0.000000e+00 : f32
    %228 = vector.broadcast %cst_64 : f32 to vector<8x256xf32>
    %229 = arith.subf %228, %225 : vector<8x256xf32>
    %230 = arith.select %227, %229, %225 : vector<8x256xi1>, vector<8x256xf32>
    %cst_65 = arith.constant 0.000000e+00 : f32
    %231 = vector.broadcast %cst_65 : f32 to vector<8x256xf32>
    %232 = arith.select %154, %230, %231 : vector<8x256xi1>, vector<8x256xf32>
    %c0_66 = arith.constant 0 : index
    %c0_67 = arith.constant 0 : index
    %233 = vector.load %arg8[%c0_66, %c0_67] : memref<8x256xf32, #tpu.memory_space<vmem>>, vector<8x256xf32>
    tpu.vector_store %arg8[%c0_66, %c0_67], %232 {strides = array<i32>} : memref<8x256xf32, #tpu.memory_space<vmem>>, vector<8x256xf32>,
    return
  }
  func.func @transform_0(%arg0: i32) -> (i32, i32) {
    %c0_i32 = arith.constant 0 : i32
    %c0_i32_0 = arith.constant 0 : i32
    return %arg0, %c0_i32 : i32, i32
  }
  func.func @transform_1(%arg0: i32) -> (i32, i32) {
    %c0_i32 = arith.constant 0 : i32
    %c0_i32_0 = arith.constant 0 : i32
    %c0_i32_1 = arith.constant 0 : i32
    return %c0_i32, %c0_i32_0 : i32, i32
  }
  func.func @transform_2(%arg0: i32) -> (i32, i32) {
    %c0_i32 = arith.constant 0 : i32
    %c0_i32_0 = arith.constant 0 : i32
    return %arg0, %c0_i32 : i32, i32
  }
  func.func @transform_3(%arg0: i32) -> (i32, i32) {
    %c0_i32 = arith.constant 0 : i32
    %c0_i32_0 = arith.constant 0 : i32
    return %arg0, %c0_i32 : i32, i32
  }
  func.func @transform_4(%arg0: i32) -> (i32, i32) {
    %c0_i32 = arith.constant 0 : i32
    %c0_i32_0 = arith.constant 0 : i32
    return %arg0, %c0_i32 : i32, i32
  }
  func.func @transform_5(%arg0: i32) -> (i32, i32) {
    %c0_i32 = arith.constant 0 : i32
    %c0_i32_0 = arith.constant 0 : i32
    return %arg0, %c0_i32 : i32, i32
  }
  func.func @transform_6(%arg0: i32) -> (i32, i32) {
    %c0_i32 = arith.constant 0 : i32
    %c0_i32_0 = arith.constant 0 : i32
    return %arg0, %c0_i32 : i32, i32
  }
  func.func @transform_7(%arg0: i32) -> (i32, i32) {
    %c0_i32 = arith.constant 0 : i32
    %c0_i32_0 = arith.constant 0 : i32
    return %arg0, %c0_i32 : i32, i32
  }
}

</mosaic_0001>

<bundles_post_ra>
// kernel: operators_forward.1
= control target key start
LH: loop header
LB: loop body
LE: loop exit
PB: predicated region body
PF: predicated region fallthrough
CT: control target
= control target key end

     0   :  { %v474_v1 = vmov 3   ;;  %v475_v2 = vmov 2   ;;  %s476_s26 = smov 127   ;;  %s477_s27 = smov 15   ;;  %v482_v5 = vmov 0   ;;  %v483_v6 = vmov 1   ;;  %s824_s2 = inlined_call_operand.vmem [shape: f32[8,256], index: 2, kind: input, shape index: {}]   ;;  %s825_s0 = inlined_call_operand.vmem [shape: f32[8,5], index: 0, kind: input, shape index: {}]   ;;  %s826_s1 = inlined_call_operand.vmem [shape: s32[1,256], index: 1, kind: input, shape index: {}]   ;;  %s827_s3 = inlined_call_operand.vmem [shape: f32[8,256], index: 3, kind: output, shape index: {0}]   ;;  %s828_s4 = inlined_call_operand.vmem [shape: f32[8,256], index: 4, kind: output, shape index: {1}]   ;;  %s829_s6 = inlined_call_operand.vmem [shape: f32[8,256], index: 6, kind: output, shape index: {3}]   ;;  %s830_s5 = inlined_call_operand.vmem [shape: f32[8,256], index: 5, kind: output, shape index: {2}]   ;;  %s831_s7 = inlined_call_operand.vmem [shape: f32[8,256], index: 7, kind: output, shape index: {4}]  }
   0x1   :  { %v19_v0 = vld [vmem:[%s824_s2] sm:$0xff]  ;;  %453 = vset.pattern.permute.xlu1 %v474_v1  ;;  %452 = vset.pattern.permute.xlu0 %v475_v2  ;;  %v20_v3 = vld [vmem:[%s824_s2 + $0x8] sm:$0xff]  ;;  %s478_s30 = smov 113   ;;  %s479_s8 = smov 1   ;;  %v484_v7 = vmov 4   ;;  %v27_v8 = vlaneseq }
   0x2   :  { %47 = vrot.lane.b32.xlu1 %v19_v0, %s476_s26  ;;  %40 = vrot.lane.b32.xlu0 %v19_v0, %s477_s27  ;;  %s480_s9 = smov 112   ;;  %s481_s10 = smov 16   ;;  %v22_v4 = vld [vmem:[%s825_s0] sm:$0xff]  ;;  %v538_v19 = vmul.f32 2.0, %v20_v3  ;;  %v540_v20 = vmul.f32 2.0, %v19_v0 }
   0x3   :  { %v21_v9 = vld [vmem:[%s826_s1] sm:$0x3]  ;;  %v56_v10 = vshrl.u32 %v27_v8, 7  ;;  %v28_v14 = vand.u32 127, %v27_v8 }
   0x4   :  { %vm39_vm0 = vcmp.eq.s32.totalorder %v21_v9, 15  ;;  %vm67_vm1 = vcmp.eq.s32.totalorder %v21_v9, 0 }
   0x5   :  { %v57_v11 = vsub.s32 0, %v56_v10  ;;  %v61_v12 = vsub.s32 1, %v56_v10  ;;  %v54_v13 = vsel %vm39_vm0, 1, %v482_v5  ;;  %vm51_vm2 = vcmp.lt.s32.totalorder %v28_v14, 127 }
   0x6   :  { %49 = vrot.lane.b32.xlu1 %v20_v3, %s476_s26  ;;  %42 = vrot.lane.b32.xlu0 %v20_v3, %s477_s27  ;;  %vm44_vm3 = vcmp.lt.s32.totalorder %v28_v14, 15  ;;  %v82_v21 = vsel %vm67_vm1, 1, %v482_v5  ;;  %vm72_vm6 = vcmp.lt.s32.totalorder %v28_v14, 113  ;;  %vm79_vm7 = vcmp.lt.s32.totalorder %v28_v14, 1 }
   0x7   :  { %v58_v15 = vrot.slane %v54_v13, %v57_v11  ;;  %v62_v16 = vrot.slane %v54_v13, %v61_v12  ;;  %v86_v30 = vrot.slane %v82_v21, %v57_v11  ;;  %v90_v31 = vrot.slane %v82_v21, %v61_v12 }
   0x8   :  { %vm29_vm10 = vcmp.lt.s32.totalorder %v28_v14, 112  ;;  %vm36_vm11 = vcmp.lt.s32.totalorder %v28_v14, 16 }
   0x9   :  { %vm63_vm4 = vcmp.eq.s32.totalorder %v58_v15, 1  ;;  %vm64_vm5 = vcmp.eq.s32.totalorder %v62_v16, 1  ;;  %vm91_vm8 = vcmp.eq.s32.totalorder %v86_v30, 1  ;;  %vm92_vm9 = vcmp.eq.s32.totalorder %v90_v31, 1 }
   0xa   :  { %70 = vrot.lane.b32.xlu1 %v20_v3, %s478_s30  ;;  %68 = vrot.lane.b32.xlu0 %v19_v0, %s478_s30 }
   0xe   :  { %77 = vrot.lane.b32.xlu1 %v20_v3, %s479_s8  ;;  %75 = vrot.lane.b32.xlu0 %v19_v0, %s479_s8 }
  0x12   :  { %25 = vrot.lane.b32.xlu1 %v20_v3, %s480_s9  ;;  %23 = vrot.lane.b32.xlu0 %v19_v0, %s480_s9 }
  0x16   :  { %34 = vrot.lane.b32.xlu1 %v20_v3, %s481_s10  ;;  %32 = vrot.lane.b32.xlu0 %v19_v0, %s481_s10 }
  0x1a   :  { %259 = vperm.xlu1 %453, %v22_v4   ;;  %253 = vperm.xlu0 %452, %v22_v4  }
  0x1e   :  { %454 = vset.pattern.permute.xlu1 %v482_v5  ;;  %455 = vset.pattern.permute.xlu0 %v483_v6 }
  0x1f   :  { %125 = vperm.xlu1 %454, %v22_v4   ;;  %131 = vperm.xlu0 %455, %v22_v4  }
  0x23   :  { %456 = vset.pattern.permute.xlu1 %v484_v7  ;;  %457 = vset.pattern.permute.xlu0 %v474_v1 }
  0x24   :  { %233 = vperm.xlu1 %456, %v22_v4  }
  0x74   :  { %v48_v17 = vpop.permute.xlu1 %47  ;;  %v41_v18 = vpop.permute.xlu0 %40 }
  0x78   :  { %v50_v22 = vpop.permute.xlu1 %49  ;;  %v43_v23 = vpop.permute.xlu0 %42 }
  0x79   :  { %v52_v24 = vsel %vm51_vm2, %v48_v17, %v50_v22  ;;  %v53_v25 = vsel %vm51_vm2, %v50_v22, %v48_v17  ;;  %v45_v26 = vsel %vm44_vm3, %v41_v18, %v43_v23  ;;  %v46_v27 = vsel %vm44_vm3, %v43_v23, %v41_v18 }
  0x7a   :  { %v65_v28 = vsel %vm63_vm4, %v46_v27, %v52_v24  ;;  %v66_v29 = vsel %vm64_vm5, %v45_v26, %v53_v25 }
  0x7b   :  { %v109_v32 = vsub.f32 %v65_v28, %v540_v20  ;;  %v110_v33 = vsub.f32 %v66_v29, %v538_v19 }
  0x7c   :  { %v71_v34 = vpop.permute.xlu1 %70  ;;  %v69_v35 = vpop.permute.xlu0 %68 }
  0x7d   :  { %v73_v38 = vsel %vm72_vm6, %v69_v35, %v71_v34  ;;  %v74_v39 = vsel %vm72_vm6, %v71_v34, %v69_v35 }
  0x80   :  { %v78_v36 = vpop.permute.xlu1 %77  ;;  %v76_v37 = vpop.permute.xlu0 %75 }
  0x81   :  { %v80_v40 = vsel %vm79_vm7, %v76_v37, %v78_v36  ;;  %v81_v41 = vsel %vm79_vm7, %v78_v36, %v76_v37 }
  0x82   :  { %v93_v42 = vsel %vm91_vm8, %v73_v38, %v81_v41  ;;  %v94_v43 = vsel %vm92_vm9, %v74_v39, %v80_v40 }
  0x83   :  { %v111_v44 = vadd.f32 %v109_v32, %v93_v42  ;;  %v112_v45 = vadd.f32 %v110_v33, %v94_v43  ;;  %v99_v48 = vsub.f32 %v65_v28, %v93_v42  ;;  %v100_v49 = vsub.f32 %v66_v29, %v94_v43 }
  0x84   :  { %v26_v46 = vpop.permute.xlu1 %25  ;;  %v24_v47 = vpop.permute.xlu0 %23 }
  0x85   :  { %v30_v52 = vsel %vm29_vm10, %v24_v47, %v26_v46  ;;  %v31_v53 = vsel %vm29_vm10, %v26_v46, %v24_v47  ;;  %v101_v56 = vmul.f32 0.5, %v99_v48  ;;  %v102_v57 = vmul.f32 0.5, %v100_v49 }
  0x86   :  { %v105_v12 = vsub.f32 %v30_v52, %v540_v20  ;;  %v106_v13 = vsub.f32 %v31_v53, %v538_v19 }
  0x87   :  { %v115_v62 = vmul.f32 %v101_v56, %v101_v56  ;;  %v116_v63 = vmul.f32 %v102_v57, %v102_v57 }
  0x88   :  { %v35_v50 = vpop.permute.xlu1 %34  ;;  %v33_v51 = vpop.permute.xlu0 %32 }
  0x89   :  { %v37_v54 = vsel %vm36_vm11, %v33_v51, %v35_v50  ;;  %v38_v55 = vsel %vm36_vm11, %v35_v50, %v33_v51 }
  0x8a   :  { %v95_v58 = vsub.f32 %v30_v52, %v38_v55  ;;  %v96_v59 = vsub.f32 %v31_v53, %v37_v54  ;;  %v107_v19 = vadd.f32 %v105_v12, %v38_v55  ;;  %v108_v25 = vadd.f32 %v106_v13, %v37_v54 }
  0x8c   :  { %v97_v60 = vmul.f32 0.5, %v95_v58  ;;  %v98_v61 = vmul.f32 0.5, %v96_v59 }
  0x8e   :  { %v113_v0 = vmul.f32 %v97_v60, %v97_v60  ;;  %v114_v1 = vmul.f32 %v98_v61, %v98_v61  ;;  %v248_v4 = vmul.f32 2.0, %v97_v60  ;;  %v249_v5 = vmul.f32 2.0, %v98_v61 }
  0x90   :  { %v544_v2 = vadd.f32 %v115_v62, %v113_v0  ;;  %v546_v3 = vadd.f32 %v116_v63, %v114_v1  ;;  %v558_v6 = vsub.f32 %v113_v0, %v115_v62  ;;  %v566_v9 = vsub.f32 %v114_v1, %v116_v63 }
  0x91   :  { %v568_v10 = vmul.f32 %v248_v4, %v101_v56  ;;  %v570_v11 = vmul.f32 %v249_v5, %v102_v57 }
  0x92   :  { %119 = vst [vmem:[%s827_s3] sm:$0xff] %v544_v2  ;;  %120 = vst [vmem:[%s827_s3 + $0x8] sm:$0xff] %v546_v3  ;;  %vm121_vm12 = vcmp.ge.f32.partialorder %v544_v2, 1e-06  ;;  %vm122_vm13 = vcmp.ge.f32.partialorder %v546_v3, 1e-06 }
  0x93   :  { %v224_v7 = vsel %vm121_vm12, %v544_v2, 1.0  ;;  %v225_v8 = vsel %vm122_vm13, %v546_v3, 1.0 }
  0x94   :  { %458 = vlog2.f32 %v224_v7 }
  0x95   :  { %v260_v14 = vpop.permute.xlu1 %259  ;;  %v254_v15 = vpop.permute.xlu0 %253  ;;  %460 = vlog2.f32 %v225_v8 }
  0x96   :  { %v262_v16 = vmul.f32 %v260_v14, %v568_v10  ;;  %v263_v17 = vmul.f32 %v260_v14, %v570_v11  ;;  %v268_v18 = vmul.f32 %v260_v14, %v558_v6  ;;  %v269_v21 = vmul.f32 %v260_v14, %v566_v9 }
  0x97   :  { %v256_v22 = vmul.f32 %v254_v15, %v558_v6  ;;  %v257_v23 = vmul.f32 %v254_v15, %v566_v9  ;;  %v270_v24 = vmul.f32 %v254_v15, %v568_v10  ;;  %v271_v20 = vmul.f32 %v254_v15, %v570_v11 }
  0x99   :  { %v264_v26 = vsub.f32 %v256_v22, %v262_v16  ;;  %v265_v27 = vsub.f32 %v257_v23, %v263_v17  ;;  %v272_v28 = vadd.f32 %v270_v24, %v268_v18  ;;  %v273_v29 = vadd.f32 %v271_v20, %v269_v21 }
  0x9a   :  { %v126_v30 = vpop.permute.xlu1 %125  ;;  %v132_v35 = vpop.permute.xlu0 %131 }
  0x9b   :  { %v266_v31 = vsub.f32 %v107_v19, %v264_v26  ;;  %v267_v32 = vsub.f32 %v108_v25, %v265_v27  ;;  %v274_v33 = vsub.f32 %v111_v44, %v272_v28  ;;  %v275_v34 = vsub.f32 %v112_v45, %v273_v29 }
  0x9c   :  { %v128_v36 = vmul.f32 %v126_v30, %v97_v60  ;;  %v129_v37 = vmul.f32 %v126_v30, %v98_v61  ;;  %v140_v38 = vmul.f32 %v126_v30, %v101_v56  ;;  %v141_v39 = vmul.f32 %v126_v30, %v102_v57 }
  0x9d   :  { %v306_v40 = vmul.f32 %v266_v31, %v126_v30  ;;  %v307_v41 = vmul.f32 %v267_v32, %v126_v30  ;;  %v314_v42 = vmul.f32 %v274_v33, %v126_v30  ;;  %v315_v43 = vmul.f32 %v275_v34, %v126_v30 }
  0x9e   :  { %v134_v46 = vmul.f32 %v132_v35, %v101_v56  ;;  %v135_v47 = vmul.f32 %v132_v35, %v102_v57  ;;  %v138_v48 = vmul.f32 %v132_v35, %v97_v60  ;;  %v139_v49 = vmul.f32 %v132_v35, %v98_v61 }
  0x9f   :  { %v308_v50 = vmul.f32 %v274_v33, %v132_v35  ;;  %v309_v51 = vmul.f32 %v275_v34, %v132_v35  ;;  %v312_v52 = vmul.f32 %v266_v31, %v132_v35  ;;  %v313_v53 = vmul.f32 %v267_v32, %v132_v35  ;;  %v623_v15 = vpop.permute.xlu1 %233 }
  0xa0   :  { %v582_v54 = vadd.f32 %v134_v46, %v128_v36  ;;  %v584_v44 = vadd.f32 %v135_v47, %v129_v37  ;;  %v586_v45 = vsub.f32 %v138_v48, %v140_v38  ;;  %v588_v55 = vsub.f32 %v139_v49, %v141_v39 }
  0xa1   :  { %v459_v58 = vpop.eup %458  ;;  %v310_v59 = vsub.f32 %v306_v40, %v308_v50  ;;  %v311_v62 = vsub.f32 %v307_v41, %v309_v51  ;;  %v316_v63 = vadd.f32 %v314_v42, %v312_v52  ;;  %v317_v56 = vadd.f32 %v315_v43, %v313_v53 }
  0xa2   :  { %v461_v57 = vpop.eup %460  ;;  %v591_v60 = vand.u32 2147483647, %v586_v45  ;;  %v594_v61 = vand.u32 2147483647, %v588_v55  ;;  %v597_v0 = vand.u32 2147483647, %v582_v54  ;;  %v276_v19 = vmul.f32 %v266_v31, %v266_v31 }
  0xa3   :  { %v600_v1 = vand.u32 2147483647, %v584_v44  ;;  %v602_v4 = vmul.f32 0.6931472, %v459_v58  ;;  %v604_v5 = vmul.f32 0.6931472, %v461_v57  ;;  %v277_v25 = vmul.f32 %v267_v32, %v267_v32 }
  0xa4   :  { %v608_v7 = vmax.f32 %v591_v60, %v597_v0  ;;  %v612_v8 = vmin.f32 %v591_v60, %v597_v0  ;;  %v278_v30 = vmul.f32 %v274_v33, %v274_v33  ;;  %v279_v35 = vmul.f32 %v275_v34, %v275_v34 }
  0xa5   :  { %v616_v12 = vmax.f32 %v594_v61, %v600_v1  ;;  %v620_v13 = vmin.f32 %v594_v61, %v600_v1  ;;  %v230_v14 = vmul.f32 0.5, %v602_v4  ;;  %v231_v21 = vmul.f32 0.5, %v604_v5 }
  0xa6   :  { %v160_v16 = vadd.f32 %v612_v8, %v608_v7  ;;  %v628_v17 = vmul.f32 0.41421357, %v608_v7  ;;  %v318_v38 = vmul.f32 %v310_v59, %v558_v6  ;;  %v280_v31 = vadd.f32 %v278_v30, %v276_v19 }
  0xa7   :  { %v161_v18 = vadd.f32 %v620_v13, %v616_v12  ;;  %v634_v22 = vmul.f32 0.41421357, %v616_v12  ;;  %v236_v23 = vsub.f32 %v623_v15, %v230_v14  ;;  %v237_v27 = vsub.f32 %v623_v15, %v231_v21 }
  0xa8   :  { %vm154_vm14 = vcmp.gt.f32.partialorder %v612_v8, %v628_v17  ;;  %v281_v32 = vadd.f32 %v279_v35, %v277_v25  ;;  %v319_v39 = vmul.f32 %v311_v62, %v566_v9  ;;  %v320_v40 = vmul.f32 %v316_v63, %v568_v10 }
  0xa9   :  { %vm155_vm15 = vcmp.gt.f32.partialorder %v620_v13, %v634_v22  ;;  %v162_v24 = vsel %vm154_vm14, %v160_v16, %v608_v7  ;;  %v434_v28 = vclamps-f32 %v236_v23, 3.0  ;;  %v435_v36 = vclamps-f32 %v237_v27, 3.0 }
  0xaa   :  { %v163_v20 = vsel %vm155_vm15, %v161_v18, %v616_v12  ;;  %vm164_vm0 = vcmp.gt.f32.partialorder %v162_v24, 0.0  ;;  %v321_v34 = vmul.f32 %v317_v56, %v570_v11  ;;  %v324_v41 = vmul.f32 %v316_v63, %v558_v6 }
  0xab   :  { %vm165_vm1 = vcmp.gt.f32.partialorder %v163_v20, 0.0  ;;  %v166_v26 = vsel %vm164_vm0, %v162_v24, 1.0  ;;  %v242_v37 = vsel %vm121_vm12, %v434_v28, 0.0  ;;  %v243_v33 = vsel %vm122_vm13, %v435_v36, 0.0 }
  0xac   :  { %v167_v29 = vsel %vm165_vm1, %v163_v20, 1.0  ;;  %462 = vrcp.f32 %v166_v26  ;;  %244 = vst [vmem:[%s828_s4] sm:$0xff] %v242_v37  ;;  %v325_v42 = vmul.f32 %v317_v56, %v566_v9  ;;  %245 = vst [vmem:[%s828_s4 + $0x8] sm:$0xff] %v243_v33  ;;  %v666_v43 = vadd.f32 %v320_v40, %v318_v38 }
  0xad   :  { %464 = vrcp.f32 %v167_v29  ;;  %v326_v46 = vmul.f32 %v310_v59, %v568_v10  ;;  %v327_v47 = vmul.f32 %v311_v62, %v570_v11  ;;  %v670_v48 = vadd.f32 %v321_v34, %v319_v39 }
  0xae   :  { %466 = vlog2.f32 %v280_v31  ;;  %v677_v6 = vand.u32 2147483647, %v666_v43  ;;  %v156_v21 = vsub.f32 %v612_v8, %v608_v7  ;;  %v157_v25 = vsub.f32 %v620_v13, %v616_v12 }
  0xaf   :  { %468 = vlog2.f32 %v281_v32  ;;  %v672_v49 = vsub.f32 %v324_v41, %v326_v46  ;;  %v674_v50 = vsub.f32 %v325_v42, %v327_v47  ;;  %v680_v9 = vand.u32 2147483647, %v670_v48 }
  0xb0   :  { %v158_v12 = vsel %vm154_vm14, %v156_v21, %v612_v8  ;;  %v159_v39 = vsel %vm155_vm15, %v157_v25, %v620_v13  ;;  %vm202_vm0 = vcmp.gt.f32.partialorder %v591_v60, %v597_v0  ;;  %vm203_vm1 = vcmp.gt.f32.partialorder %v594_v61, %v600_v1 }
  0xb1   :  { %v683_v51 = vand.u32 2147483647, %v672_v49  ;;  %v686_v10 = vand.u32 2147483647, %v674_v50 }
  0xb3   :  { %v334_v11 = vmax.f32 %v683_v51, %v677_v6  ;;  %v335_v52 = vmax.f32 %v686_v10, %v680_v9  ;;  %v694_v53 = vmin.f32 %v683_v51, %v677_v6  ;;  %v698_v58 = vmin.f32 %v686_v10, %v680_v9 }
  0xb4   :  { %vm388_vm2 = vcmp.gt.f32.partialorder %v683_v51, %v677_v6  ;;  %vm389_vm3 = vcmp.gt.f32.partialorder %v686_v10, %v680_v9 }
  0xb5   :  { %v704_v59 = vmul.f32 0.41421357, %v334_v11  ;;  %v706_v62 = vmul.f32 0.41421357, %v335_v52  ;;  %v342_v63 = vsub.f32 %v694_v53, %v334_v11  ;;  %v343_v56 = vsub.f32 %v698_v58, %v335_v52 }
  0xb6   :  { %v346_v14 = vadd.f32 %v694_v53, %v334_v11  ;;  %v347_v16 = vadd.f32 %v698_v58, %v335_v52 }
  0xb7   :  { %vm340_vm4 = vcmp.gt.f32.partialorder %v694_v53, %v704_v59  ;;  %vm341_vm5 = vcmp.gt.f32.partialorder %v698_v58, %v706_v62 }
  0xb8   :  { %v722_v20 = vsel %vm340_vm4, %v342_v63, %v694_v53  ;;  %v728_v19 = vsel %vm341_vm5, %v343_v56, %v698_v58  ;;  %v348_v7 = vsel %vm340_vm4, %v346_v14, %v334_v11  ;;  %v349_v27 = vsel %vm341_vm5, %v347_v16, %v335_v52 }
  0xb9   :  { %v463_v57 = vpop.eup %462  ;;  %vm350_vm6 = vcmp.gt.f32.partialorder %v348_v7, 0.0  ;;  %vm351_vm7 = vcmp.gt.f32.partialorder %v349_v27, 0.0 }
  0xba   :  { %v465_v18 = vpop.eup %464  ;;  %v170_v23 = vmul.f32 %v463_v57, %v166_v26  ;;  %v352_v30 = vsel %vm350_vm6, %v348_v7, 1.0  ;;  %v353_v38 = vsel %vm351_vm7, %v349_v27, 1.0  ;;  %vm214_vm6 = vcmp.lt.f32.partialorder %v586_v45, 0.0 }
  0xbb   :  { %v171_v24 = vmul.f32 %v465_v18, %v167_v29  ;;  %v467_v28 = vpop.eup %466  ;;  %470 = vrcp.f32 %v352_v30  ;;  %vm215_vm7 = vcmp.lt.f32.partialorder %v588_v55, 0.0 }
  0xbc   :  { %v172_v26 = vsub.f32 2.0, %v170_v23  ;;  %v469_v35 = vpop.eup %468  ;;  %v283_v37 = vmul.f32 0.6931472, %v467_v28  ;;  %472 = vrcp.f32 %v353_v38 }
  0xbd   :  { %v173_v29 = vsub.f32 2.0, %v171_v24  ;;  %v285_v32 = vmul.f32 0.6931472, %v469_v35 }
  0xbe   :  { %v174_v36 = vmul.f32 %v463_v57, %v172_v26  ;;  %v286_v33 = vmul.f32 0.5, %v283_v37 }
  0xbf   :  { %v175_v31 = vmul.f32 %v465_v18, %v173_v29  ;;  %v287_v41 = vmul.f32 0.5, %v285_v32 }
  0xc0   :  { %v176_v40 = vmul.f32 %v174_v36, %v158_v12  ;;  %v288_v46 = vadd.f32 -0.6931472, %v286_v33 }
  0xc1   :  { %v177_v34 = vmul.f32 %v175_v31, %v159_v39  ;;  %v289_v11 = vadd.f32 -0.6931472, %v287_v41 }
  0xc2   :  { %v178_v42 = vmul.f32 %v176_v40, %v176_v40  ;;  %v290_v63 = vadd.f32 %v288_v46, %v623_v15 }
  0xc3   :  { %v179_v47 = vmul.f32 %v177_v34, %v177_v34  ;;  %v291_v57 = vadd.f32 %v289_v11, %v623_v15 }
  0xc4   :  { %v180_v52 = vmul.f32 0.080537446, %v178_v42  ;;  %v292_v16 = vsub.f32 %v290_v63, %v602_v4 }
  0xc5   :  { %v181_v56 = vmul.f32 0.080537446, %v179_v47  ;;  %v293_v21 = vsub.f32 %v291_v57, %v604_v5 }
  0xc6   :  { %v430_v14 = vadd.f32 -0.13877685, %v180_v52  ;;  %vm294_vm8 = vcmp.ge.f32.partialorder %v292_v16, -6.9077554  ;;  %v298_v24 = vmax.f32 %v292_v16, -2.5902672 }
  0xc7   :  { %v431_v18 = vadd.f32 -0.13877685, %v181_v56  ;;  %vm295_vm9 = vcmp.ge.f32.partialorder %v293_v21, -6.9077554  ;;  %v299_v25 = vmax.f32 %v293_v21, -2.5902672  ;;  %vm752_vm10 = vmand %vm121_vm12, %vm294_vm8 }
  0xc8   :  { %v184_v23 = vmul.f32 %v430_v14, %v178_v42  ;;  %v300_v27 = vmin.f32 %v298_v24, 3.0  ;;  %v471_v28 = vpop.eup %470  ;;  %vm758_vm11 = vmand %vm122_vm13, %vm295_vm9  ;;  %v485_v24 = vmov 0.0  }
  0xc9   :  { %v185_v7 = vmul.f32 %v431_v18, %v179_v47  ;;  %v301_v4 = vmin.f32 %v299_v25, 3.0  ;;  %v473_v35 = vpop.eup %472  ;;  %v356_v12 = vmul.f32 %v471_v28, %v352_v30  ;;  %v384_v2 = vsel %vm340_vm4, 0.7853982, %v485_v24 }
  0xca   :  { %v186_v26 = vadd.f32 0.19977711, %v184_v23  ;;  %v302_v37 = vsel %vm752_vm10, %v300_v27, -6.9077554  ;;  %v357_v39 = vmul.f32 %v473_v35, %v353_v38  ;;  %v385_v3 = vsel %vm341_vm5, 0.7853982, %v485_v24 }
  0xcb   :  { %v187_v29 = vadd.f32 0.19977711, %v185_v7  ;;  %v303_v32 = vsel %vm758_vm11, %v301_v4, -6.9077554  ;;  %304 = vst [vmem:[%s829_s6] sm:$0xff] %v302_v37  ;;  %v358_v41 = vsub.f32 2.0, %v356_v12  ;;  %vm400_vm4 = vcmp.lt.f32.partialorder %v672_v49, 0.0 }
  0xcc   :  { %v188_v36 = vmul.f32 %v186_v26, %v178_v42  ;;  %305 = vst [vmem:[%s829_s6 + $0x8] sm:$0xff] %v303_v32  ;;  %v359_v11 = vsub.f32 2.0, %v357_v39  ;;  %v198_v7 = vsel %vm154_vm14, 0.7853982, %v485_v24  ;;  %vm208_vm14 = vcmp.lt.f32.partialorder %v582_v54, 0.0 }
  0xcd   :  { %v189_v31 = vmul.f32 %v187_v29, %v179_v47  ;;  %v360_v63 = vmul.f32 %v471_v28, %v358_v41  ;;  %vm401_vm5 = vcmp.lt.f32.partialorder %v674_v50, 0.0 }
  0xce   :  { %v432_v33 = vadd.f32 -0.3333295, %v188_v36  ;;  %v361_v56 = vmul.f32 %v473_v35, %v359_v11 }
  0xcf   :  { %v433_v46 = vadd.f32 -0.3333295, %v189_v31  ;;  %v362_v14 = vmul.f32 %v360_v63, %v722_v20 }
  0xd0   :  { %v192_v52 = vmul.f32 %v432_v33, %v178_v42  ;;  %v363_v18 = vmul.f32 %v361_v56, %v728_v19  ;;  %v199_v42 = vsel %vm155_vm15, 0.7853982, %v485_v24  ;;  %vm209_vm15 = vcmp.lt.f32.partialorder %v584_v44, 0.0 }
  0xd1   :  { %v193_v30 = vmul.f32 %v433_v46, %v179_v47  ;;  %v364_v38 = vmul.f32 %v362_v14, %v362_v14 }
  0xd2   :  { %v194_v57 = vmul.f32 %v192_v52, %v176_v40  ;;  %v365_v25 = vmul.f32 %v363_v18, %v363_v18 }
  0xd3   :  { %v195_v16 = vmul.f32 %v193_v30, %v177_v34  ;;  %v366_v26 = vmul.f32 0.080537446, %v364_v38 }
  0xd4   :  { %v196_v21 = vadd.f32 %v194_v57, %v176_v40  ;;  %v367_v20 = vmul.f32 0.080537446, %v365_v25 }
  0xd5   :  { %v197_v23 = vadd.f32 %v195_v16, %v177_v34  ;;  %v436_v29 = vadd.f32 -0.13877685, %v366_v26 }
  0xd6   :  { %v200_v47 = vadd.f32 %v198_v7, %v196_v21  ;;  %v437_v40 = vadd.f32 -0.13877685, %v367_v20 }
  0xd7   :  { %v201_v27 = vadd.f32 %v199_v42, %v197_v23  ;;  %v370_v17 = vmul.f32 %v436_v29, %v364_v38 }
  0xd8   :  { %v204_v28 = vsub.f32 1.5707964, %v200_v47  ;;  %v371_v13 = vmul.f32 %v437_v40, %v365_v25 }
  0xd9   :  { %v205_v19 = vsub.f32 1.5707964, %v201_v27  ;;  %v372_v35 = vadd.f32 0.19977711, %v370_v17 }
  0xda   :  { %v206_v8 = vsel %vm202_vm0, %v204_v28, %v200_v47  ;;  %v373_v37 = vadd.f32 0.19977711, %v371_v13 }
  0xdb   :  { %v207_v34 = vsel %vm203_vm1, %v205_v19, %v201_v27  ;;  %v210_v4 = vsub.f32 3.1415927, %v206_v8  ;;  %v374_v0 = vmul.f32 %v372_v35, %v364_v38 }
  0xdc   :  { %v211_v22 = vsub.f32 3.1415927, %v207_v34  ;;  %v375_v61 = vmul.f32 %v373_v37, %v365_v25 }
  0xdd   :  { %v212_v36 = vsel %vm208_vm14, %v210_v4, %v206_v8  ;;  %v438_v32 = vadd.f32 -0.3333295, %v374_v0 }
  0xde   :  { %v213_v12 = vsel %vm209_vm15, %v211_v22, %v207_v34  ;;  %v216_v60 = vsub.f32 0.0, %v212_v36  ;;  %v439_v33 = vadd.f32 -0.3333295, %v375_v61 }
  0xdf   :  { %v217_v31 = vsub.f32 0.0, %v213_v12  ;;  %v378_v41 = vmul.f32 %v438_v32, %v364_v38 }
  0xe0   :  { %v218_v1 = vsel %vm214_vm6, %v216_v60, %v212_v36  ;;  %v379_v45 = vmul.f32 %v439_v33, %v365_v25 }
  0xe1   :  { %v219_v39 = vsel %vm215_vm7, %v217_v31, %v213_v12  ;;  %v220_v54 = vsel %vm121_vm12, %v218_v1, 0.0  ;;  %v380_v55 = vmul.f32 %v378_v41, %v362_v14  ;;  %vm394_vm12 = vcmp.lt.f32.partialorder %v666_v43, 0.0 }
  0xe2   :  { %v221_v44 = vsel %vm122_vm13, %v219_v39, 0.0  ;;  %222 = vst [vmem:[%s830_s5] sm:$0xff] %v220_v54  ;;  %v381_v46 = vmul.f32 %v379_v45, %v363_v18  ;;  %vm395_vm13 = vcmp.lt.f32.partialorder %v670_v48, 0.0 }
  0xe3   :  { %223 = vst [vmem:[%s830_s5 + $0x8] sm:$0xff] %v221_v44  ;;  %v382_v11 = vadd.f32 %v380_v55, %v362_v14 }
  0xe4   :  { %v383_v52 = vadd.f32 %v381_v46, %v363_v18 }
  0xe5   :  { %v386_v63 = vadd.f32 %v384_v2, %v382_v11 }
  0xe6   :  { %v387_v30 = vadd.f32 %v385_v3, %v383_v52 }
  0xe7   :  { %v390_v56 = vsub.f32 1.5707964, %v386_v63 }
  0xe8   :  { %v391_v57 = vsub.f32 1.5707964, %v387_v30 }
  0xe9   :  { %v392_v16 = vsel %vm388_vm2, %v390_v56, %v386_v63 }
  0xea   :  { %v393_v14 = vsel %vm389_vm3, %v391_v57, %v387_v30  ;;  %v396_v18 = vsub.f32 3.1415927, %v392_v16 }
  0xeb   :  { %v397_v53 = vsub.f32 3.1415927, %v393_v14 }
  0xec   :  { %v398_v58 = vsel %vm394_vm12, %v396_v18, %v392_v16 }
  0xed   :  { %v399_v59 = vsel %vm395_vm13, %v397_v53, %v393_v14  ;;  %v402_v62 = vsub.f32 0.0, %v398_v58 }
  0xee   :  { %v403_v21 = vsub.f32 0.0, %v399_v59 }
  0xef   :  { %v404_v6 = vsel %vm400_vm4, %v402_v62, %v398_v58 }
  0xf0   :  { %v405_v51 = vsel %vm401_vm5, %v403_v21, %v399_v59  ;;  %v406_v9 = vsel %vm752_vm10, %v404_v6, 0.0 }
  0xf1   :  { %v407_v10 = vsel %vm758_vm11, %v405_v51, 0.0  ;;  %408 = vst [vmem:[%s831_s7] sm:$0xff] %v406_v9 }
  0xf2   :  { %409 = vst [vmem:[%s831_s7 + $0x8] sm:$0xff] %v407_v10 }

</bundles_post_ra>
